<compile_context>
chip_gen: v6e
topology: v6e:2x2x1
jax: 0.10.0
libtpu: 0.0.40
codegen_flags: <defaults>
</compile_context>

<pallas_src>
import functools
import math

import jax
import jax.numpy as jnp
from jax.experimental import pallas as pl
from jax.experimental.pallas import tpu as pltpu


def make_positional_encoding_buffer(max_len: int, d_model: int) -> jnp.ndarray:
    """Deterministic buffer, identical to the PyTorch __init__ construction."""
    position = jnp.arange(max_len, dtype=jnp.float32)[:, None]            # (max_len, 1)
    div_term = jnp.exp(
        jnp.arange(0, d_model, 2, dtype=jnp.float32) * (-math.log(10000.0) / d_model)
    )                                                                      # (d_model//2,)
    pe = jnp.zeros((max_len, d_model), dtype=jnp.float32)
    pe = pe.at[:, 0::2].set(jnp.sin(position * div_term))
    pe = pe.at[:, 1::2].set(jnp.cos(position * div_term))
    return pe[None]                                                        # (1, max_len, d_model)


def _pick_block(n: int, align: int, cap: int) -> int:
    """Largest b <= cap with n % b == 0 and b % align == 0; falls back to n (full dim)."""
    if n <= cap:
        return n
    b = (cap // align) * align
    while b >= align:
        if n % b == 0:
            return b
        b -= align
    return n


def _posenc_kernel(seed_ref, x_ref, pe_ref, o_ref, *,
                   p: float, training: bool, sd_total: int, tb: int, tc: int):
    # x_ref/o_ref block: (tb, tc) ; pe_ref block: (1, tc) -> broadcast over rows.
    y = x_ref[...] + pe_ref[...]

    if training and 0.0 < p < 1.0:
        # Stateless counter-based PRNG: hash(global element index, seed) -> uint32.
        # NOTE: cannot bit-match torch's RNG stream, only dropout semantics.
        r0 = pl.program_id(0) * tb
        c0 = pl.program_id(1) * tc
        rows = jax.lax.broadcasted_iota(jnp.int32, (tb, tc), 0) + r0
        cols = jax.lax.broadcasted_iota(jnp.int32, (tb, tc), 1) + c0
        idx = rows * sd_total + cols                                   # global element id
        seed_mix = (seed_ref[0] * jnp.int32(-1640531527)).astype(jnp.uint32)  # golden ratio
        h = idx.astype(jnp.uint32) ^ seed_mix
        # lowbias32-style avalanche mix
        h = h ^ (h >> jnp.uint32(16))
        h = h * jnp.uint32(0x7FEB352D)
        h = h ^ (h >> jnp.uint32(15))
        h = h * jnp.uint32(0x846CA68B)
        h = h ^ (h >> jnp.uint32(16))
        thr = jnp.uint32(min(int(round(p * 4294967296.0)), 4294967295))
        keep = h >= thr                                                # P(keep) = 1 - p
        scale = jnp.asarray(1.0 / (1.0 - p), dtype=y.dtype)
        y = jnp.where(keep, y * scale, jnp.zeros_like(y))
    elif training and p >= 1.0:
        y = jnp.zeros_like(y)

    o_ref[...] = y.astype(o_ref.dtype)


def positional_encoding_forward(x, pe, *, p: float = 0.1, training: bool = False, seed: int = 0):
    """x: (B, S, D); pe: (1, max_len, D) float32 buffer."""
    B, S, D = x.shape
    _, max_len, d_pe = pe.shape
    assert d_pe == D and S <= max_len
    SD = S * D

    # Lane-dense 2D views: last dim is S*D (multiple of 128 for typical shapes).
    x2 = x.reshape(B, SD)
    itemsize = jnp.dtype(x.dtype).itemsize

    TB = _pick_block(B, 8, 256)
    col_cap = max(128, ((1 << 20) // max(1, TB * itemsize)) // 128 * 128)
    TC = _pick_block(SD, 128, col_cap)

    if SD % 128 == 0:
        # Pass the full buffer; the pe BlockSpec only ever DMAs the first S*D columns.
        pe2 = pe.reshape(1, max_len * D)
    else:
        # TODO(synk): pad S*D up to a lane multiple instead of pre-slicing for odd shapes.
        pe2 = jax.lax.slice(pe, (0, 0, 0), (1, S, D)).reshape(1, SD)

    seed_arr = jnp.asarray([seed], dtype=jnp.int32)
    kernel = functools.partial(_posenc_kernel, p=float(p), training=bool(training),
                               sd_total=SD, tb=TB, tc=TC)

    grid = (B // TB, SD // TC)
    grid_spec = pltpu.PrefetchScalarGridSpec(
        num_scalar_prefetch=1,                    # seed lives in SMEM
        grid=grid,
        in_specs=[
            pl.BlockSpec((TB, TC), lambda i, j, seed_ref: (i, j)),   # x tile
            pl.BlockSpec((1, TC),  lambda i, j, seed_ref: (0, j)),   # pe tile (shared over rows)
        ],
        out_specs=pl.BlockSpec((TB, TC), lambda i, j, seed_ref: (i, j)),
    )

    out2 = pl.pallas_call(
        kernel,
        out_shape=jax.ShapeDtypeStruct((B, SD), x.dtype),
        grid_spec=grid_spec,
        compiler_params=pltpu.CompilerParams(
            dimension_semantics=("parallel", "parallel")),
    )(seed_arr, x2, pe2)
    return out2.reshape(B, S, D)


if __name__ == "__main__":
    # Small shapes consistent with the module: batch=2, seq=8, d_model=32.
    B, S, D = 2, 8, 32
    MAX_LEN = 5000
    P_DROP = 0.1

    key = jax.random.PRNGKey(0)
    x = jax.random.normal(key, (B, S, D), dtype=jnp.float32)
    pe = make_positional_encoding_buffer(MAX_LEN, D)

    # Eval-mode forward (dropout is identity): deterministic, check vs. reference.
    y_eval = positional_encoding_forward(x, pe, p=P_DROP, training=False)
    y_eval = jax.block_until_ready(y_eval)
    ref = x + pe[:, :S, :]
    assert jnp.allclose(y_eval, ref, atol=1e-6, rtol=1e-6), "eval-mode mismatch"

    # Training-mode forward (inverted dropout): kept elements equal ref / (1 - p),
    # dropped elements are exactly zero.
    y_train = positional_encoding_forward(x, pe, p=P_DROP, training=True, seed=1234)
    y_train = jax.block_until_ready(y_train)
    assert y_train.shape == (B, S, D)
    scaled_ref = ref / (1.0 - P_DROP)
    kept = y_train != 0.0
    assert jnp.allclose(jnp.where(kept, y_train, scaled_ref), scaled_ref,
                        atol=1e-5, rtol=1e-5), "train-mode mismatch"

    print("KERNEL_OK")
</pallas_src>

<mosaic_0001>
module attributes {stable_mosaic.version = 11 : i64} {
  func.func @_posenc_kernel(%arg0: i32, %arg1: i32, %arg2: memref<1xi32, #tpu.memory_space<smem>>, %arg3: memref<2x256xf32, #tpu.memory_space<vmem>>, %arg4: memref<1x256xf32, #tpu.memory_space<vmem>>, %arg5: memref<2x256xf32, #tpu.memory_space<vmem>>) attributes {dimension_semantics = [#tpu.dimension_semantics<parallel>, #tpu.dimension_semantics<parallel>], iteration_bounds = array<i64: 1, 1>, scalar_prefetch = 1 : i64, scratch_operands = 0 : i64, tpu.core_type = #tpu.core_type<tc>, window_params = [{transform_indices = @transform_0, window_bounds = array<i64: 2, 256>}, {transform_indices = @transform_1, window_bounds = array<i64: 1, 256>}, {transform_indices = @transform_2, window_bounds = array<i64: 2, 256>}]} {
    %c0 = arith.constant 0 : index
    %c0_0 = arith.constant 0 : index
    %0 = vector.load %arg3[%c0, %c0_0] : memref<2x256xf32, #tpu.memory_space<vmem>>, vector<2x256xf32>
    %c0_1 = arith.constant 0 : index
    %c0_2 = arith.constant 0 : index
    %1 = vector.load %arg4[%c0_1, %c0_2] : memref<1x256xf32, #tpu.memory_space<vmem>>, vector<1x256xf32>
    %2 = vector.broadcast %1 : vector<1x256xf32> to vector<2x256xf32>
    %3 = arith.addf %0, %2 : vector<2x256xf32>
    %c0_3 = arith.constant 0 : index
    %c0_4 = arith.constant 0 : index
    %4 = vector.load %arg5[%c0_3, %c0_4] : memref<2x256xf32, #tpu.memory_space<vmem>>, vector<2x256xf32>
    tpu.vector_store %arg5[%c0_3, %c0_4], %3 {strides = array<i32>} : memref<2x256xf32, #tpu.memory_space<vmem>>, vector<2x256xf32>,
    return
  }
  func.func @transform_0(%arg0: i32, %arg1: i32, %arg2: memref<1xi32, #tpu.memory_space<smem>>) -> (i32, i32) {
    %c0_i32 = arith.constant 0 : i32
    return %arg0, %arg1 : i32, i32
  }
  func.func @transform_1(%arg0: i32, %arg1: i32, %arg2: memref<1xi32, #tpu.memory_space<smem>>) -> (i32, i32) {
    %c0_i32 = arith.constant 0 : i32
    %c0_i32_0 = arith.constant 0 : i32
    return %c0_i32, %arg1 : i32, i32
  }
  func.func @transform_2(%arg0: i32, %arg1: i32, %arg2: memref<1xi32, #tpu.memory_space<smem>>) -> (i32, i32) {
    %c0_i32 = arith.constant 0 : i32
    return %arg0, %arg1 : i32, i32
  }
}

</mosaic_0001>

<bundles_post_ra>
// kernel: tpu_custom_call.1
= control target key start
LH: loop header
LB: loop body
LE: loop exit
PB: predicated region body
PF: predicated region fallthrough
CT: control target
= control target key end

     0   :  { %9 = vsyncpa [#allocation5], 0  ;;  %s179_s0 = inlined_call_operand.<no memory space> [shape: s32[1], index: 0, kind: input, shape index: {}]   ;;  %s180_s1 = inlined_call_operand.hbm [shape: f32[2,256], index: 1, kind: input, shape index: {}]   ;;  %s181_s2 = inlined_call_operand.hbm [shape: f32[1,160000], index: 2, kind: input, shape index: {}]   ;;  %s182_s3 = inlined_call_operand.hbm [shape: f32[2,256], index: 3, kind: output, shape index: {}]  }
   0x1   :  { %10 = vsyncpa [#allocation8], 0 }
   0x2   :  { %11 = vsyncpa [#allocation6], 0  ;;  %s146_s12 = smov [#allocation4]   ;;  %s147_s14 = smov [#allocation7]  }
   0x3   :  { %s18_s13 = sshll.u32 %s146_s12, 4  ;;  %s28_s15 = sshll.u32 %s147_s14, 4  ;;  %s19_s13 = int_to_ptr.vmem [resolvable:$true] %s18_s13  ;;  %s29_s15 = int_to_ptr.vmem [resolvable:$true] %s28_s15 }
   0x4   :  { %s88_s16 = scalar_lea.vmem %s19_s13, 64  ;;  %p93_p1 = scmp.lt.s32.totalorder %s19_s13, %s19_s13 }
   0x5   :  { %p89_p0 = scmp.ne.s32.totalorder %s19_s13, %s88_s16  ;;  %p94_p2 = scmp.lt.s32.totalorder %s88_s16, %s88_s16 }
   0x7   :  { %p95_p3 = por %p94_p2, %p93_p1 }
   0x9   :  { %p96_p4 = pnand %p95_p3, %p89_p0 }
   0xb   :  { %99 = shalt.err (!%p96_p4)
}
   0xc   :  { %21 = dma.hbm_to_vmem [thread:$0]  %s180_s1, 64, %s19_s13, [#allocation5]  }
   0xd   :  { %s108_s18 = scalar_lea.vmem %s29_s15, 32  ;;  %p113_p6 = scmp.lt.s32.totalorder %s29_s15, %s29_s15 }
   0xe   :  { %p109_p5 = scmp.ne.s32.totalorder %s29_s15, %s108_s18  ;;  %p114_p7 = scmp.lt.s32.totalorder %s108_s18, %s108_s18 }
  0x10   :  { %p115_p8 = por %p114_p7, %p113_p6 }
  0x12   :  { %p116_p9 = pnand %p115_p8, %p109_p5 }
  0x14   :  { %119 = shalt.err (!%p116_p9)
}
  0x15   :  { %31 = dma.hbm_to_vmem [thread:$0]  %s181_s2, 32, %s29_s15, [#allocation8]  }
  0x16   :  { %140 = dma.done.wait [#allocation5], 64  }
  0x17   :  { %141 = vsyncadd [#allocation5], 4294967232 }
  0x18   :  { %142 = dma.done.wait [#allocation8], 32  }
  0x19   :  { %143 = vsyncadd [#allocation8], 4294967264  ;;  %v41_v0 = vlaneseq  ;;  %v148_v1 = vmov 1983009808   ;;  %v39_v7 = vld [vmem:[#allocation7] sm:$0x3] }
  0x1a   :  { %v51_v2 = vunpack.c.l.s4 %v148_v1  ;;  %v38_v12 = vld [vmem:[#allocation4] sm:$0xf]  ;;  %s149_s1 = smov [#allocation9]  }
  0x1b   :  { %v42_v3 = vshrl.u32 %v41_v0, 7  ;;  %s66_s21 = sshll.u32 %s149_s1, 4  ;;  %s67_s21 = int_to_ptr.vmem [resolvable:$true] %s66_s21 }
  0x1c   :  { %v52_v6 = vunpack.c.0.s8 %v51_v2  ;;  %s120_s2 = scalar_lea.vmem %s67_s21, 64  ;;  %p125_p11 = scmp.lt.s32.totalorder %s67_s21, %s67_s21 }
  0x1d   :  { %v43_v4 = vsub.s32 0, %v42_v3  ;;  %v47_v5 = vsub.s32 1, %v42_v3  ;;  %p121_p10 = scmp.ne.s32.totalorder %s67_s21, %s120_s2  ;;  %p126_p12 = scmp.lt.s32.totalorder %s120_s2, %s120_s2 }
  0x1e   :  { %v55_v10 = vsub.s32 %v52_v6, %v42_v3 }
  0x1f   :  { %v44_v8 = vrot.slane %v39_v7, %v43_v4  ;;  %v48_v9 = vrot.slane %v39_v7, %v47_v5  ;;  %p127_p13 = por %p126_p12, %p125_p11 }
  0x21   :  { %v49_v11 = vcombine.low %v44_v8, %v48_v9  ;;  %p128_p0 = pnand %p127_p13, %p121_p10 }
  0x23   :  { %v56_v13 = vrot.slane %v49_v11, %v55_v10 }
  0x25   :  { %v58_v14 = vadd.f32 %v56_v13, %v38_v12 }
  0x27   :  { %59 = vst [vmem:[#allocation9] sm:$0xf] %v58_v14 }
  0x28   :  { %131 = shalt.err (!%p128_p0)
}
  0x29   :  { %69 = dma.vmem_to_hbm [thread:$0]  %s67_s21, 64, %s182_s3, [#allocation6]  }
  0x2a   :  { %144 = dma.done.wait [#allocation6], 64  }
  0x2b   :  { %145 = vsyncadd [#allocation6], 4294967232 }
  0x2c   :  { %73 = vsyncpa [#allocation5], 1 }
  0x2d   :  { %74 = vsyncpa [#allocation8], 1 }
  0x2e   :  { %75 = vsyncpa [#allocation6], 1 }

</bundles_post_ra>
